<compile_context>
chip_gen: v7x
topology: tpu7x:2x2x1
jax: 0.10.0
libtpu: 0.0.40
codegen_flags: <defaults>
</compile_context>

<pallas_src>
import functools

import jax
import jax.numpy as jnp
from jax.experimental import pallas as pl
from jax.experimental.pallas import tpu as pltpu


def _round_up(n, m):
    return ((n + m - 1) // m) * m


def _decode_kernel(x_ref, lvl_ref, id_ref, o_ref, *, n_lvl, f_chunk,
                   min_val, bin_len):
    # x_ref:   (TB, Dp)  compute dtype
    # lvl_ref: (Q,  Dp)  compute dtype -- whole lvl_hvs, VMEM resident
    # id_ref:  (TF, Dp)  compute dtype
    # o_ref:   (TB, TF)  float32
    x = x_ref[...]
    tf = o_ref.shape[1]
    n_chunks = tf // f_chunk

    for c in range(n_chunks):                 # static unroll over 128-lane slabs
        lo = c * f_chunk
        idc = id_ref[lo:lo + f_chunk, :]      # (f_chunk, Dp); reused across q
        best = None
        idx = None
        for q in range(n_lvl):                # static unroll over levels
            # Fuse the level hv into x on the VPU (+/-1 sign flip, exact).
            xq = x * lvl_ref[q:q + 1, :]
            s = jax.lax.dot_general(          # (TB, f_chunk), f32 accumulate
                xq, idc,
                dimension_numbers=(((1,), (1,)), ((), ())),
                preferred_element_type=jnp.float32)
            if q == 0:
                best = s
                idx = jnp.zeros_like(s)
            else:
                take = s > best               # strict '>' => first-max tie-break
                best = jnp.where(take, s, best)
                idx = jnp.where(take, jnp.float32(q), idx)
        o_ref[:, lo:lo + f_chunk] = min_val + idx * bin_len


def id_level_decode(x, id_hvs, lvl_hvs, *, bin_len, min_val, max_val,
                    block_b=128, block_f=512, f_chunk=128,
                    compute_dtype=jnp.bfloat16):
    """Pallas implementation of IDLevelDecoder.forward. Returns (B, F) f32."""
    del max_val  # forward pass only needs min_val / bin_len
    B, D = x.shape
    F, Dq = id_hvs.shape
    Q, Dl = lvl_hvs.shape
    assert D == Dq == Dl

    item = jnp.dtype(compute_dtype).itemsize

    # Pad D to a lane multiple (zeros contribute 0 to every score).
    dp = _round_up(D, 128)

    # Batch tile: multiple of 8 (sublanes).  Feature tile: multiple of the
    # 128-lane argmax chunk (lane-dense unmasked output stores).
    tb = _round_up(min(block_b, B), 8)
    tf = _round_up(min(block_f, _round_up(F, f_chunk)), f_chunk)

    # --- VMEM budget: actual double-buffered tile footprint, capped by the
    # physical VMEM of this chip (64 MiB on v7x, 128 MiB on v5e/v6e).
    def _est(tb_, tf_):
        return (2 * tb_ * dp * item        # x tile (double-buffered)
                + 2 * tf_ * dp * item      # id tile (double-buffered)
                + 2 * Q * dp * item        # lvl hvs (resident; x2 for safety)
                + 2 * tb_ * tf_ * 4)       # output tile (double-buffered)

    try:
        vmem_cap = int(pltpu.get_tpu_info().vmem_capacity_bytes)
    except Exception:  # pragma: no cover - conservative fallback
        vmem_cap = 64 * 1024 * 1024
    budget = max(24 * 1024 * 1024, vmem_cap - 16 * 1024 * 1024)

    while tf > f_chunk and _est(tb, tf) > budget:
        tf = max(f_chunk, (tf // 2 // f_chunk) * f_chunk)
    while tb > 8 and _est(tb, tf) > budget:
        tb = max(8, (tb // 2 // 8) * 8)
    f_chunk = min(f_chunk, tf)

    vmem_limit = int(min(budget, max(_est(tb, tf) + (8 << 20), 16 << 20)))

    # --- Pad operands (skip the copy when already aligned).
    bp = _round_up(B, tb)
    fp = _round_up(F, tf)

    x_c = x.astype(compute_dtype)
    id_c = id_hvs.astype(compute_dtype)
    lvl_c = lvl_hvs.astype(compute_dtype)

    if (bp, dp) != (B, D):
        x_p = jnp.zeros((bp, dp), compute_dtype).at[:B, :D].set(x_c)
    else:
        x_p = x_c
    if (fp, dp) != (F, D):
        id_p = jnp.zeros((fp, dp), compute_dtype).at[:F, :D].set(id_c)
    else:
        id_p = id_c
    if dp != D:
        lvl_p = jnp.zeros((Q, dp), compute_dtype).at[:, :D].set(lvl_c)
    else:
        lvl_p = lvl_c

    nb = bp // tb
    nf = fp // tf

    kernel = functools.partial(
        _decode_kernel, n_lvl=Q, f_chunk=f_chunk,
        min_val=float(min_val), bin_len=float(bin_len))

    # Grid-order traffic heuristic: the outer-resident operand is fetched once,
    # the inner operand streams once per outer tile.
    if nf * bp <= nb * fp:
        # id tile resident per outer F tile, x streamed (small/medium batch).
        grid = (nf, nb)
        in_specs = [
            pl.BlockSpec((tb, dp), lambda fi, bi: (bi, 0)),   # x (streams)
            pl.BlockSpec((Q, dp), lambda fi, bi: (0, 0)),     # lvl (resident)
            pl.BlockSpec((tf, dp), lambda fi, bi: (fi, 0)),   # id (per F tile)
        ]
        out_spec = pl.BlockSpec((tb, tf), lambda fi, bi: (bi, fi))
    else:
        # Large batch: keep the x tile resident, stream the id tiles.
        grid = (nb, nf)
        in_specs = [
            pl.BlockSpec((tb, dp), lambda bi, fi: (bi, 0)),   # x (resident)
            pl.BlockSpec((Q, dp), lambda bi, fi: (0, 0)),     # lvl (resident)
            pl.BlockSpec((tf, dp), lambda bi, fi: (fi, 0)),   # id (streams)
        ]
        out_spec = pl.BlockSpec((tb, tf), lambda bi, fi: (bi, fi))

    out = pl.pallas_call(
        kernel,
        out_shape=jax.ShapeDtypeStruct((bp, fp), jnp.float32),
        grid=grid,
        in_specs=in_specs,
        out_specs=out_spec,
        compiler_params=pltpu.CompilerParams(
            # Only the outer axis is sharded across TensorCores; the inner
            # streamed axis is "arbitrary" so the resident block is not
            # re-fetched per core.
            dimension_semantics=("parallel", "arbitrary"),
            vmem_limit_bytes=vmem_limit),
    )(x_p, lvl_p, id_p)

    return out[:B, :F]


def _reference(x, id_hvs, lvl_hvs, *, bin_len, min_val):
    scores = jnp.einsum('bd,fd,qd->bfq', x, id_hvs, lvl_hvs)
    return min_val + jnp.argmax(scores, axis=2).astype(jnp.float32) * bin_len


if __name__ == "__main__":
    B, D, F, Q = 6, 32, 16, 8            # batch, hv-dim, features, levels
    min_val, max_val = 0.0, 1.0
    bin_len = (max_val - min_val) / Q

    key = jax.random.PRNGKey(0)
    kx, kid, klvl = jax.random.split(key, 3)

    # x quantized to multiples of 1/8 -> exactly representable in bf16, so the
    # bf16 MXU path matches the f32 reference bit-for-bit (incl. tie-breaking).
    x = jnp.round(
        jax.random.uniform(kx, (B, D), jnp.float32, min_val, max_val) * 8.0) / 8.0
    id_hvs = jnp.where(jax.random.bernoulli(kid, 0.5, (F, D)),
                       1.0, -1.0).astype(jnp.float32)
    lvl_hvs = jnp.where(jax.random.bernoulli(klvl, 0.5, (Q, D)),
                        1.0, -1.0).astype(jnp.float32)

    out = id_level_decode(x, id_hvs, lvl_hvs,
                          bin_len=bin_len, min_val=min_val, max_val=max_val)
    out = jax.block_until_ready(out)

    ref = _reference(x, id_hvs, lvl_hvs, bin_len=bin_len, min_val=min_val)
    assert out.shape == (B, F) and out.dtype == jnp.float32
    assert jnp.allclose(out, ref, atol=1e-6), (out, ref)

    print("KERNEL_OK")
</pallas_src>

<mosaic_0001>
module attributes {stable_mosaic.version = 11 : i64} {
  func.func @_decode_kernel(%arg0: i32, %arg1: i32, %arg2: memref<8x128xbf16, #tpu.memory_space<vmem>>, %arg3: memref<8x128xbf16, #tpu.memory_space<vmem>>, %arg4: memref<128x128xbf16, #tpu.memory_space<vmem>>, %arg5: memref<8x128xf32, #tpu.memory_space<vmem>>) attributes {dimension_semantics = [#tpu.dimension_semantics<parallel>, #tpu.dimension_semantics<arbitrary>], iteration_bounds = array<i64: 1, 1>, scalar_prefetch = 0 : i64, scratch_operands = 0 : i64, tpu.core_type = #tpu.core_type<tc>, window_params = [{transform_indices = @transform_0, window_bounds = array<i64: 8, 128>}, {pipeline_mode = #tpu.pipeline_mode<synchronous>, transform_indices = @transform_1, window_bounds = array<i64: 8, 128>}, {transform_indices = @transform_2, window_bounds = array<i64: 128, 128>}, {transform_indices = @transform_3, window_bounds = array<i64: 8, 128>}]} {
    %c0 = arith.constant 0 : index
    %c0_0 = arith.constant 0 : index
    %0 = vector.load %arg2[%c0, %c0_0] : memref<8x128xbf16, #tpu.memory_space<vmem>>, vector<8x128xbf16>
    %c0_1 = arith.constant 0 : index
    %c0_2 = arith.constant 0 : index
    %1 = vector.load %arg4[%c0_1, %c0_2] : memref<128x128xbf16, #tpu.memory_space<vmem>>, vector<128x128xbf16>
    %c0_3 = arith.constant 0 : index
    %c0_4 = arith.constant 0 : index
    %2 = vector.load %arg3[%c0_3, %c0_4] : memref<8x128xbf16, #tpu.memory_space<vmem>>, vector<1x128xbf16>
    %3 = vector.broadcast %2 : vector<1x128xbf16> to vector<8x128xbf16>
    %4 = arith.mulf %0, %3 : vector<8x128xbf16>
    %cst = arith.constant dense<0.000000e+00> : vector<8x128xf32>
    %5 = tpu.matmul %4, %1, %cst {dimension_numbers = #tpu.dot_dimension_numbers<[1], [1], [0], [0], [0, 0, 1, 0], [], []>} : vector<8x128xbf16>, vector<128x128xbf16>, vector<8x128xf32> -> vector<8x128xf32>
    %cst_5 = arith.constant 0.000000e+00 : f32
    %6 = vector.broadcast %cst_5 : f32 to vector<8x128xf32>
    %c1 = arith.constant 1 : index
    %c0_6 = arith.constant 0 : index
    %7 = vector.load %arg3[%c1, %c0_6] : memref<8x128xbf16, #tpu.memory_space<vmem>>, vector<1x128xbf16>
    %8 = vector.broadcast %7 : vector<1x128xbf16> to vector<8x128xbf16>
    %9 = arith.mulf %0, %8 : vector<8x128xbf16>
    %cst_7 = arith.constant dense<0.000000e+00> : vector<8x128xf32>
    %10 = tpu.matmul %9, %1, %cst_7 {dimension_numbers = #tpu.dot_dimension_numbers<[1], [1], [0], [0], [0, 0, 1, 0], [], []>} : vector<8x128xbf16>, vector<128x128xbf16>, vector<8x128xf32> -> vector<8x128xf32>
    %11 = arith.cmpf ogt, %10, %5 : vector<8x128xf32>
    %12 = arith.select %11, %10, %5 : vector<8x128xi1>, vector<8x128xf32>
    %cst_8 = arith.constant 1.000000e+00 : f32
    %13 = vector.broadcast %cst_8 : f32 to vector<8x128xf32>
    %14 = arith.select %11, %13, %6 : vector<8x128xi1>, vector<8x128xf32>
    %c2 = arith.constant 2 : index
    %c0_9 = arith.constant 0 : index
    %15 = vector.load %arg3[%c2, %c0_9] : memref<8x128xbf16, #tpu.memory_space<vmem>>, vector<1x128xbf16>
    %16 = vector.broadcast %15 : vector<1x128xbf16> to vector<8x128xbf16>
    %17 = arith.mulf %0, %16 : vector<8x128xbf16>
    %cst_10 = arith.constant dense<0.000000e+00> : vector<8x128xf32>
    %18 = tpu.matmul %17, %1, %cst_10 {dimension_numbers = #tpu.dot_dimension_numbers<[1], [1], [0], [0], [0, 0, 1, 0], [], []>} : vector<8x128xbf16>, vector<128x128xbf16>, vector<8x128xf32> -> vector<8x128xf32>
    %19 = arith.cmpf ogt, %18, %12 : vector<8x128xf32>
    %20 = arith.select %19, %18, %12 : vector<8x128xi1>, vector<8x128xf32>
    %cst_11 = arith.constant 2.000000e+00 : f32
    %21 = vector.broadcast %cst_11 : f32 to vector<8x128xf32>
    %22 = arith.select %19, %21, %14 : vector<8x128xi1>, vector<8x128xf32>
    %c3 = arith.constant 3 : index
    %c0_12 = arith.constant 0 : index
    %23 = vector.load %arg3[%c3, %c0_12] : memref<8x128xbf16, #tpu.memory_space<vmem>>, vector<1x128xbf16>
    %24 = vector.broadcast %23 : vector<1x128xbf16> to vector<8x128xbf16>
    %25 = arith.mulf %0, %24 : vector<8x128xbf16>
    %cst_13 = arith.constant dense<0.000000e+00> : vector<8x128xf32>
    %26 = tpu.matmul %25, %1, %cst_13 {dimension_numbers = #tpu.dot_dimension_numbers<[1], [1], [0], [0], [0, 0, 1, 0], [], []>} : vector<8x128xbf16>, vector<128x128xbf16>, vector<8x128xf32> -> vector<8x128xf32>
    %27 = arith.cmpf ogt, %26, %20 : vector<8x128xf32>
    %28 = arith.select %27, %26, %20 : vector<8x128xi1>, vector<8x128xf32>
    %cst_14 = arith.constant 3.000000e+00 : f32
    %29 = vector.broadcast %cst_14 : f32 to vector<8x128xf32>
    %30 = arith.select %27, %29, %22 : vector<8x128xi1>, vector<8x128xf32>
    %c4 = arith.constant 4 : index
    %c0_15 = arith.constant 0 : index
    %31 = vector.load %arg3[%c4, %c0_15] : memref<8x128xbf16, #tpu.memory_space<vmem>>, vector<1x128xbf16>
    %32 = vector.broadcast %31 : vector<1x128xbf16> to vector<8x128xbf16>
    %33 = arith.mulf %0, %32 : vector<8x128xbf16>
    %cst_16 = arith.constant dense<0.000000e+00> : vector<8x128xf32>
    %34 = tpu.matmul %33, %1, %cst_16 {dimension_numbers = #tpu.dot_dimension_numbers<[1], [1], [0], [0], [0, 0, 1, 0], [], []>} : vector<8x128xbf16>, vector<128x128xbf16>, vector<8x128xf32> -> vector<8x128xf32>
    %35 = arith.cmpf ogt, %34, %28 : vector<8x128xf32>
    %36 = arith.select %35, %34, %28 : vector<8x128xi1>, vector<8x128xf32>
    %cst_17 = arith.constant 4.000000e+00 : f32
    %37 = vector.broadcast %cst_17 : f32 to vector<8x128xf32>
    %38 = arith.select %35, %37, %30 : vector<8x128xi1>, vector<8x128xf32>
    %c5 = arith.constant 5 : index
    %c0_18 = arith.constant 0 : index
    %39 = vector.load %arg3[%c5, %c0_18] : memref<8x128xbf16, #tpu.memory_space<vmem>>, vector<1x128xbf16>
    %40 = vector.broadcast %39 : vector<1x128xbf16> to vector<8x128xbf16>
    %41 = arith.mulf %0, %40 : vector<8x128xbf16>
    %cst_19 = arith.constant dense<0.000000e+00> : vector<8x128xf32>
    %42 = tpu.matmul %41, %1, %cst_19 {dimension_numbers = #tpu.dot_dimension_numbers<[1], [1], [0], [0], [0, 0, 1, 0], [], []>} : vector<8x128xbf16>, vector<128x128xbf16>, vector<8x128xf32> -> vector<8x128xf32>
    %43 = arith.cmpf ogt, %42, %36 : vector<8x128xf32>
    %44 = arith.select %43, %42, %36 : vector<8x128xi1>, vector<8x128xf32>
    %cst_20 = arith.constant 5.000000e+00 : f32
    %45 = vector.broadcast %cst_20 : f32 to vector<8x128xf32>
    %46 = arith.select %43, %45, %38 : vector<8x128xi1>, vector<8x128xf32>
    %c6 = arith.constant 6 : index
    %c0_21 = arith.constant 0 : index
    %47 = vector.load %arg3[%c6, %c0_21] : memref<8x128xbf16, #tpu.memory_space<vmem>>, vector<1x128xbf16>
    %48 = vector.broadcast %47 : vector<1x128xbf16> to vector<8x128xbf16>
    %49 = arith.mulf %0, %48 : vector<8x128xbf16>
    %cst_22 = arith.constant dense<0.000000e+00> : vector<8x128xf32>
    %50 = tpu.matmul %49, %1, %cst_22 {dimension_numbers = #tpu.dot_dimension_numbers<[1], [1], [0], [0], [0, 0, 1, 0], [], []>} : vector<8x128xbf16>, vector<128x128xbf16>, vector<8x128xf32> -> vector<8x128xf32>
    %51 = arith.cmpf ogt, %50, %44 : vector<8x128xf32>
    %52 = arith.select %51, %50, %44 : vector<8x128xi1>, vector<8x128xf32>
    %cst_23 = arith.constant 6.000000e+00 : f32
    %53 = vector.broadcast %cst_23 : f32 to vector<8x128xf32>
    %54 = arith.select %51, %53, %46 : vector<8x128xi1>, vector<8x128xf32>
    %c7 = arith.constant 7 : index
    %c0_24 = arith.constant 0 : index
    %55 = vector.load %arg3[%c7, %c0_24] : memref<8x128xbf16, #tpu.memory_space<vmem>>, vector<1x128xbf16>
    %56 = vector.broadcast %55 : vector<1x128xbf16> to vector<8x128xbf16>
    %57 = arith.mulf %0, %56 : vector<8x128xbf16>
    %cst_25 = arith.constant dense<0.000000e+00> : vector<8x128xf32>
    %58 = tpu.matmul %57, %1, %cst_25 {dimension_numbers = #tpu.dot_dimension_numbers<[1], [1], [0], [0], [0, 0, 1, 0], [], []>} : vector<8x128xbf16>, vector<128x128xbf16>, vector<8x128xf32> -> vector<8x128xf32>
    %59 = arith.cmpf ogt, %58, %52 : vector<8x128xf32>
    %cst_26 = arith.constant 7.000000e+00 : f32
    %60 = vector.broadcast %cst_26 : f32 to vector<8x128xf32>
    %61 = arith.select %59, %60, %54 : vector<8x128xi1>, vector<8x128xf32>
    %cst_27 = arith.constant 1.250000e-01 : f32
    %62 = vector.broadcast %cst_27 : f32 to vector<8x128xf32>
    %63 = arith.mulf %61, %62 : vector<8x128xf32>
    %cst_28 = arith.constant 0.000000e+00 : f32
    %64 = vector.broadcast %cst_28 : f32 to vector<8x128xf32>
    %65 = arith.addf %64, %63 : vector<8x128xf32>
    %c0_29 = arith.constant 0 : index
    %c0_30 = arith.constant 0 : index
    %66 = vector.load %arg5[%c0_29, %c0_30] : memref<8x128xf32, #tpu.memory_space<vmem>>, vector<8x128xf32>
    tpu.vector_store %arg5[%c0_29, %c0_30], %65 {strides = array<i32>} : memref<8x128xf32, #tpu.memory_space<vmem>>, vector<8x128xf32>,
    return
  }
  func.func @transform_0(%arg0: i32, %arg1: i32) -> (i32, i32) {
    %c0_i32 = arith.constant 0 : i32
    %c0_i32_0 = arith.constant 0 : i32
    return %arg1, %c0_i32 : i32, i32
  }
  func.func @transform_1(%arg0: i32, %arg1: i32) -> (i32, i32) {
    %c0_i32 = arith.constant 0 : i32
    %c0_i32_0 = arith.constant 0 : i32
    %c0_i32_1 = arith.constant 0 : i32
    return %c0_i32, %c0_i32_0 : i32, i32
  }
  func.func @transform_2(%arg0: i32, %arg1: i32) -> (i32, i32) {
    %c0_i32 = arith.constant 0 : i32
    %c0_i32_0 = arith.constant 0 : i32
    return %arg0, %c0_i32 : i32, i32
  }
  func.func @transform_3(%arg0: i32, %arg1: i32) -> (i32, i32) {
    %c0_i32 = arith.constant 0 : i32
    return %arg1, %arg0 : i32, i32
  }
}

</mosaic_0001>

<bundles_post_ra>
// kernel: tpu_custom_call.1
= control target key start
LH: loop header
LB: loop body
LE: loop exit
PB: predicated region body
PF: predicated region fallthrough
CT: control target
= control target key end

     0   :  { %8 = vsyncpa [#allocation3], 0  ;;  %s1148_s0 = inlined_call_operand.hbm [shape: bf16[8,128], index: 0, kind: input, shape index: {}]   ;;  %s1149_s1 = inlined_call_operand.hbm [shape: bf16[8,128], index: 1, kind: input, shape index: {}]   ;;  %s1150_s2 = inlined_call_operand.hbm [shape: bf16[128,128], index: 2, kind: input, shape index: {}]   ;;  %s1151_s3 = inlined_call_operand.hbm [shape: f32[8,128], index: 3, kind: output, shape index: {}]  }
   0x1   :  { %9 = vsyncpa [#allocation6], 0 }
   0x2   :  { %10 = vsyncpa [#allocation4], 0  ;;  %s895_s12 = smov [#allocation5]   ;;  %s896_s14 = smov [#allocation2]  }
   0x3   :  { %s27_s13 = sshll.u32 %s895_s12, 4  ;;  %s17_s15 = sshll.u32 %s896_s14, 4  ;;  %s28_s13 = int_to_ptr.vmem [resolvable:$true] %s27_s13  ;;  %s18_s15 = int_to_ptr.vmem [resolvable:$true] %s17_s15 }
   0x4   :  { %s801_s18 = scalar_lea.hbm %s1149_s1, 64 }
   0x5   :  { %p802_p0 = scmp.ne.s32.totalorder %s1149_s1, %s801_s18  ;;  %p805_p1 = scmp.lt.u32.totalorder %s801_s18, %s1149_s1 }
   0x7   :  { %p807_p2 = pnand %p805_p1, %p802_p0 }
   0x9   :  { %810 = shalt.err (!%p807_p2)
}
   0xa   :  { %s811_s23 = scalar_lea.vmem %s28_s13, 64  ;;  %p816_p4 = scmp.lt.s32.totalorder %s28_s13, %s28_s13 }
   0xb   :  { %p812_p3 = scmp.ne.s32.totalorder %s28_s13, %s811_s23  ;;  %p817_p5 = scmp.lt.s32.totalorder %s811_s23, %s811_s23 }
   0xd   :  { %p818_p6 = por %p817_p5, %p816_p4 }
   0xf   :  { %p819_p7 = pnand %p818_p6, %p812_p3 }
  0x11   :  { %822 = shalt.err (!%p819_p7)
}
  0x12   :  { %30 = dma.hbm_to_vmem [thread:$0]  %s1149_s1, 64, %s28_s13, [#allocation6]  }
  0x13   :  { %s823_s28 = scalar_lea.hbm %s1148_s0, 64 }
  0x14   :  { %p824_p8 = scmp.ne.s32.totalorder %s1148_s0, %s823_s28  ;;  %p827_p9 = scmp.lt.u32.totalorder %s823_s28, %s1148_s0 }
  0x16   :  { %p829_p10 = pnand %p827_p9, %p824_p8 }
  0x18   :  { %832 = shalt.err (!%p829_p10)
}
  0x19   :  { %s833_s6 = scalar_lea.vmem %s18_s15, 64  ;;  %p838_p12 = scmp.lt.s32.totalorder %s18_s15, %s18_s15 }
  0x1a   :  { %p834_p11 = scmp.ne.s32.totalorder %s18_s15, %s833_s6  ;;  %p839_p13 = scmp.lt.s32.totalorder %s833_s6, %s833_s6 }
  0x1c   :  { %p840_p0 = por %p839_p13, %p838_p12 }
  0x1e   :  { %p841_p1 = pnand %p840_p0, %p834_p11 }
  0x20   :  { %844 = shalt.err (!%p841_p1)
}
  0x21   :  { %20 = dma.hbm_to_vmem [thread:$0]  %s1148_s0, 64, %s18_s15, [#allocation3]  }
  0x22   :  { %s897_s8 = smov [#allocation7]   ;;  %s845_s12 = scalar_lea.hbm %s1150_s2, 1024 }
  0x23   :  { %s36_s9 = sshll.u32 %s897_s8, 4  ;;  %p846_p2 = scmp.ne.s32.totalorder %s1150_s2, %s845_s12  ;;  %s37_s9 = int_to_ptr.vmem [resolvable:$true] %s36_s9 }
  0x24   :  { %p849_p3 = scmp.lt.u32.totalorder %s845_s12, %s1150_s2 }
  0x26   :  { %p851_p4 = pnand %p849_p3, %p846_p2 }
  0x28   :  { %854 = shalt.err (!%p851_p4)
}
  0x29   :  { %s855_s18 = scalar_lea.vmem %s37_s9, 1024  ;;  %p860_p6 = scmp.lt.s32.totalorder %s37_s9, %s37_s9 }
  0x2a   :  { %p856_p5 = scmp.ne.s32.totalorder %s37_s9, %s855_s18  ;;  %p861_p7 = scmp.lt.s32.totalorder %s855_s18, %s855_s18 }
  0x2c   :  { %p862_p8 = por %p861_p7, %p860_p6 }
  0x2e   :  { %p863_p9 = pnand %p862_p8, %p856_p5 }
  0x30   :  { %866 = shalt.err (!%p863_p9)
}
  0x31   :  { %s898_s0 = smov 64   ;;  %s899_s15 = smov 4  }
  0x32   :  { %42 = dma.hbm_to_vmem [thread:$0]  %s1150_s2, 1024, %s37_s9, [#allocation6], %s898_s0, %s898_s0, %s899_s15  }
  0x33   :  { %889 = dma.done.wait [#allocation3], 64  }
  0x34   :  { %890 = vsyncadd [#allocation3], 4294967232 }
  0x35   :  { %891 = dma.done.wait [#allocation6], 1088  }
  0x36   :  { %892 = vsyncadd [#allocation6], 4294966208  ;;  %v900_v0 = vmov 0.0   ;;  %vm901_vm0 = vmmov 0   ;;  %v965_v1 = vld [vmem:[#allocation7] sm:$0xff]   ;;  %v971_v2 = vld [vmem:[#allocation7 + $0x8] sm:$0xff]   ;;  %v74_v7 = vlaneseq }
  0x37   :  { %625 = vmatprep.subr.bf16.mxu0 %v900_v0  ;;  %645 = vmatprep.subr.bf16.mxu1 %v900_v0  ;;  %v977_v3 = vld [vmem:[#allocation7 + $0x10] sm:$0xff]   ;;  %v983_v4 = vld [vmem:[#allocation7 + $0x18] sm:$0xff]   ;;  %v989_v5 = vld [vmem:[#allocation7 + $0x20] sm:$0xff]   ;;  %s902_s2 = smov [#allocation8]  }
  0x38   :  { %641 = vmatprep.mubr.msk.bf16.mxu0 %vm901_vm0, %v900_v0  ;;  %661 = vmatprep.mubr.msk.bf16.mxu1 %vm901_vm0, %v900_v0  ;;  %v995_v6 = vld [vmem:[#allocation7 + $0x28] sm:$0xff]   ;;  %v1001_v8 = vld [vmem:[#allocation7 + $0x30] sm:$0xff]   ;;  %v70_v9 = vld [vmem:[#allocation5] sm:$0x1]  ;;  %v1003_v10 = vshrl.u32 %v74_v7, 7  ;;  %s535_s21 = sshll.u32 %s902_s2, 4  ;;  %s536_s21 = int_to_ptr.vmem [resolvable:$true] %s535_s21 }
  0x39   :  { %626 = vmatpush3.bf16.xpose.msra.mxu0 %v965_v1  ;;  %646 = vmatpush3.bf16.xpose.msra.mxu1 %v965_v1  ;;  %v167_v11 = vshrl.u32 %v70_v9, 16  ;;  %v72_v12 = vpack.i.b16 %v70_v9, %v70_v9  ;;  %v1010_v15 = vld [vmem:[#allocation7 + $0x38] sm:$0xff]   ;;  %s867_s22 = scalar_lea.vmem %s536_s21, 128  ;;  %p872_p11 = scmp.lt.s32.totalorder %s536_s21, %s536_s21 }
  0x3a   :  { %627 = vmatprep.subr.bf16.mxu0 %v900_v0  ;;  %647 = vmatprep.subr.bf16.mxu1 %v900_v0  ;;  %v76_v13 = vsub.s32 0, %v1003_v10  ;;  %v1014_v18 = vld [vmem:[#allocation2] sm:$0xf]  ;;  %v218_v21 = vld [vmem:[#allocation5] sm:$0x2]  ;;  %v224_v24 = vsub.s32 1, %v1003_v10  ;;  %p868_p10 = scmp.ne.s32.totalorder %s536_s21, %s867_s22  ;;  %p873_p12 = scmp.lt.s32.totalorder %s867_s22, %s867_s22 }
  0x3b   :  { %v168_v14 = vpack.i.b16 %v167_v11, %v167_v11  ;;  %v270_v22 = vshrl.u32 %v218_v21, 16  ;;  %v220_v23 = vpack.i.b16 %v218_v21, %v218_v21  ;;  %v321_v30 = vld [vmem:[#allocation5] sm:$0x4]  ;;  %v327_v33 = vsub.s32 2, %v1003_v10  ;;  %v424_v39 = vld [vmem:[#allocation5] sm:$0x8] }
  0x3c   :  { %v77_v16 = vrot.slane %v72_v12, %v76_v13  ;;  %v373_v31 = vshrl.u32 %v321_v30, 16  ;;  %v323_v32 = vpack.i.b16 %v321_v30, %v321_v30  ;;  %v476_v40 = vshrl.u32 %v424_v39, 16  ;;  %p874_p13 = por %p873_p12, %p872_p11 }
  0x3d   :  { %v173_v17 = vrot.slane %v168_v14, %v76_v13  ;;  %v271_v25 = vpack.i.b16 %v270_v22, %v270_v22  ;;  %v225_v26 = vrot.slane %v220_v23, %v224_v24  ;;  %v426_v41 = vpack.i.b16 %v424_v39, %v424_v39 }
  0x3e   :  { %v78_v19 = vmul.bf16 %v77_v16, %v1014_v18  ;;  %v374_v34 = vpack.i.b16 %v373_v31, %v373_v31  ;;  %v328_v35 = vrot.slane %v323_v32, %v327_v33  ;;  %v430_v42 = vsub.s32 3, %v1003_v10  ;;  %p875_p0 = pnand %p874_p13, %p868_p10 }
  0x3f   :  { %v174_v20 = vmul.bf16 %v173_v17, %v1014_v18  ;;  %v276_v27 = vrot.slane %v271_v25, %v224_v24  ;;  %v226_v28 = vmul.bf16 %v225_v26, %v1014_v18  ;;  %v477_v43 = vpack.i.b16 %v476_v40, %v476_v40 }
  0x40   :  { %v379_v36 = vrot.slane %v374_v34, %v327_v33  ;;  %v329_v37 = vmul.bf16 %v328_v35, %v1014_v18  ;;  %v431_v44 = vrot.slane %v426_v41, %v430_v42 }
  0x41   :  { %628 = vmatpush3.bf16.xpose.msra.mxu0 %v971_v2  ;;  %648 = vmatpush3.bf16.xpose.msra.mxu1 %v971_v2  ;;  %v277_v29 = vmul.bf16 %v276_v27, %v1014_v18  ;;  %v482_v45 = vrot.slane %v477_v43, %v430_v42 }
  0x42   :  { %629 = vmatprep.subr.bf16.mxu0 %v900_v0  ;;  %649 = vmatprep.subr.bf16.mxu1 %v900_v0  ;;  %v380_v38 = vmul.bf16 %v379_v36, %v1014_v18  ;;  %v432_v46 = vmul.bf16 %v431_v44, %v1014_v18 }
  0x43   :  { %v483_v47 = vmul.bf16 %v482_v45, %v1014_v18 }
  0x49   :  { %630 = vmatpush3.bf16.xpose.msra.mxu0 %v977_v3  ;;  %650 = vmatpush3.bf16.xpose.msra.mxu1 %v977_v3 }
  0x4a   :  { %631 = vmatprep.subr.bf16.mxu0 %v900_v0  ;;  %651 = vmatprep.subr.bf16.mxu1 %v900_v0 }
  0x51   :  { %632 = vmatpush3.bf16.xpose.msra.mxu0 %v983_v4  ;;  %652 = vmatpush3.bf16.xpose.msra.mxu1 %v983_v4 }
  0x52   :  { %633 = vmatprep.subr.bf16.mxu0 %v900_v0  ;;  %653 = vmatprep.subr.bf16.mxu1 %v900_v0 }
  0x59   :  { %634 = vmatpush3.bf16.xpose.msra.mxu0 %v989_v5  ;;  %654 = vmatpush3.bf16.xpose.msra.mxu1 %v989_v5 }
  0x5a   :  { %635 = vmatprep.subr.bf16.mxu0 %v900_v0  ;;  %655 = vmatprep.subr.bf16.mxu1 %v900_v0 }
  0x61   :  { %636 = vmatpush3.bf16.xpose.msra.mxu0 %v995_v6  ;;  %656 = vmatpush3.bf16.xpose.msra.mxu1 %v995_v6 }
  0x62   :  { %637 = vmatprep.subr.bf16.mxu0 %v900_v0  ;;  %657 = vmatprep.subr.bf16.mxu1 %v900_v0 }
  0x69   :  { %638 = vmatpush3.bf16.xpose.msra.mxu0 %v1001_v8  ;;  %658 = vmatpush3.bf16.xpose.msra.mxu1 %v1001_v8 }
  0x6a   :  { %639 = vmatprep.subr.bf16.mxu0 %v900_v0  ;;  %659 = vmatprep.subr.bf16.mxu1 %v900_v0 }
  0x71   :  { %640 = vmatpush3.bf16.xpose.msra.mxu0 %v1010_v15  ;;  %660 = vmatpush3.bf16.xpose.msra.mxu1 %v1010_v15 }
  0x72   :  { %665 = vmatprep.subr.bf16.mxu0 %v900_v0  ;;  %685 = vmatprep.subr.bf16.mxu1 %v900_v0 }
  0x78   :  { %642 = vmatmul.mubr.bf16.vlgmr.msra.gmra.mrb[0].mxu0 %v78_v19  ;;  %662 = vmatmul.mubr.bf16.vlgmr.msra.gmra.mrb[0].mxu1 %v174_v20 }
  0x79   :  { %666 = vmatpush3.bf16.xpose.msra.mxu0 %v965_v1  ;;  %686 = vmatpush3.bf16.xpose.msra.mxu1 %v965_v1 }
  0x7a   :  { %667 = vmatprep.subr.bf16.mxu0 %v900_v0  ;;  %687 = vmatprep.subr.bf16.mxu1 %v900_v0 }
  0x7b   :  { %681 = vmatprep.mubr.msk.bf16.mxu0 %vm901_vm0, %v900_v0  ;;  %701 = vmatprep.mubr.msk.bf16.mxu1 %vm901_vm0, %v900_v0 }
  0x81   :  { %668 = vmatpush3.bf16.xpose.msra.mxu0 %v971_v2  ;;  %688 = vmatpush3.bf16.xpose.msra.mxu1 %v971_v2 }
  0x82   :  { %669 = vmatprep.subr.bf16.mxu0 %v900_v0  ;;  %689 = vmatprep.subr.bf16.mxu1 %v900_v0 }
  0x89   :  { %670 = vmatpush3.bf16.xpose.msra.mxu0 %v977_v3  ;;  %690 = vmatpush3.bf16.xpose.msra.mxu1 %v977_v3 }
  0x8a   :  { %671 = vmatprep.subr.bf16.mxu0 %v900_v0  ;;  %691 = vmatprep.subr.bf16.mxu1 %v900_v0 }
  0x91   :  { %672 = vmatpush3.bf16.xpose.msra.mxu0 %v983_v4  ;;  %692 = vmatpush3.bf16.xpose.msra.mxu1 %v983_v4 }
  0x92   :  { %673 = vmatprep.subr.bf16.mxu0 %v900_v0  ;;  %693 = vmatprep.subr.bf16.mxu1 %v900_v0 }
  0x99   :  { %674 = vmatpush3.bf16.xpose.msra.mxu0 %v989_v5  ;;  %694 = vmatpush3.bf16.xpose.msra.mxu1 %v989_v5 }
  0x9a   :  { %675 = vmatprep.subr.bf16.mxu0 %v900_v0  ;;  %695 = vmatprep.subr.bf16.mxu1 %v900_v0 }
  0xa1   :  { %676 = vmatpush3.bf16.xpose.msra.mxu0 %v995_v6  ;;  %696 = vmatpush3.bf16.xpose.msra.mxu1 %v995_v6 }
  0xa2   :  { %677 = vmatprep.subr.bf16.mxu0 %v900_v0  ;;  %697 = vmatprep.subr.bf16.mxu1 %v900_v0 }
  0xa9   :  { %678 = vmatpush3.bf16.xpose.msra.mxu0 %v1001_v8  ;;  %698 = vmatpush3.bf16.xpose.msra.mxu1 %v1001_v8 }
  0xaa   :  { %679 = vmatprep.subr.bf16.mxu0 %v900_v0  ;;  %699 = vmatprep.subr.bf16.mxu1 %v900_v0 }
  0xb1   :  { %680 = vmatpush3.bf16.xpose.msra.mxu0 %v1010_v15  ;;  %700 = vmatpush3.bf16.xpose.msra.mxu1 %v1010_v15 }
  0xb2   :  { %705 = vmatprep.subr.bf16.mxu0 %v900_v0  ;;  %725 = vmatprep.subr.bf16.mxu1 %v900_v0 }
  0xb8   :  { %682 = vmatmul.mubr.bf16.vlgmr.msra.gmra.mrb[4].mxu0 %v226_v28  ;;  %702 = vmatmul.mubr.bf16.vlgmr.msra.gmra.mrb[4].mxu1 %v277_v29 }
  0xb9   :  { %706 = vmatpush3.bf16.xpose.msra.mxu0 %v965_v1  ;;  %726 = vmatpush3.bf16.xpose.msra.mxu1 %v965_v1 }
  0xba   :  { %707 = vmatprep.subr.bf16.mxu0 %v900_v0  ;;  %727 = vmatprep.subr.bf16.mxu1 %v900_v0 }
  0xbb   :  { %721 = vmatprep.mubr.msk.bf16.mxu0 %vm901_vm0, %v900_v0  ;;  %741 = vmatprep.mubr.msk.bf16.mxu1 %vm901_vm0, %v900_v0 }
  0xc1   :  { %708 = vmatpush3.bf16.xpose.msra.mxu0 %v971_v2  ;;  %728 = vmatpush3.bf16.xpose.msra.mxu1 %v971_v2 }
  0xc2   :  { %709 = vmatprep.subr.bf16.mxu0 %v900_v0  ;;  %729 = vmatprep.subr.bf16.mxu1 %v900_v0 }
  0xc9   :  { %710 = vmatpush3.bf16.xpose.msra.mxu0 %v977_v3  ;;  %730 = vmatpush3.bf16.xpose.msra.mxu1 %v977_v3 }
  0xca   :  { %711 = vmatprep.subr.bf16.mxu0 %v900_v0  ;;  %731 = vmatprep.subr.bf16.mxu1 %v900_v0 }
  0xd1   :  { %712 = vmatpush3.bf16.xpose.msra.mxu0 %v983_v4  ;;  %732 = vmatpush3.bf16.xpose.msra.mxu1 %v983_v4 }
  0xd2   :  { %713 = vmatprep.subr.bf16.mxu0 %v900_v0  ;;  %733 = vmatprep.subr.bf16.mxu1 %v900_v0 }
  0xd9   :  { %714 = vmatpush3.bf16.xpose.msra.mxu0 %v989_v5  ;;  %734 = vmatpush3.bf16.xpose.msra.mxu1 %v989_v5 }
  0xda   :  { %715 = vmatprep.subr.bf16.mxu0 %v900_v0  ;;  %735 = vmatprep.subr.bf16.mxu1 %v900_v0 }
  0xe1   :  { %716 = vmatpush3.bf16.xpose.msra.mxu0 %v995_v6  ;;  %736 = vmatpush3.bf16.xpose.msra.mxu1 %v995_v6 }
  0xe2   :  { %717 = vmatprep.subr.bf16.mxu0 %v900_v0  ;;  %737 = vmatprep.subr.bf16.mxu1 %v900_v0 }
  0xe9   :  { %718 = vmatpush3.bf16.xpose.msra.mxu0 %v1001_v8  ;;  %738 = vmatpush3.bf16.xpose.msra.mxu1 %v1001_v8 }
  0xea   :  { %719 = vmatprep.subr.bf16.mxu0 %v900_v0  ;;  %739 = vmatprep.subr.bf16.mxu1 %v900_v0 }
  0xf1   :  { %720 = vmatpush3.bf16.xpose.msra.mxu0 %v1010_v15  ;;  %740 = vmatpush3.bf16.xpose.msra.mxu1 %v1010_v15 }
  0xf2   :  { %745 = vmatprep.subr.bf16.mxu0 %v900_v0  ;;  %765 = vmatprep.subr.bf16.mxu1 %v900_v0 }
  0xf8   :  { %722 = vmatmul.mubr.bf16.vlgmr.msra.gmra.mrb[8].mxu0 %v329_v37  ;;  %742 = vmatmul.mubr.bf16.vlgmr.msra.gmra.mrb[8].mxu1 %v380_v38 }
  0xf9   :  { %746 = vmatpush3.bf16.xpose.msra.mxu0 %v965_v1  ;;  %766 = vmatpush3.bf16.xpose.msra.mxu1 %v965_v1 }
  0xfa   :  { %747 = vmatprep.subr.bf16.mxu0 %v900_v0  ;;  %767 = vmatprep.subr.bf16.mxu1 %v900_v0 }
  0xfb   :  { %761 = vmatprep.mubr.msk.bf16.mxu0 %vm901_vm0, %v900_v0  ;;  %781 = vmatprep.mubr.msk.bf16.mxu1 %vm901_vm0, %v900_v0 }
 0x101   :  { %748 = vmatpush3.bf16.xpose.msra.mxu0 %v971_v2  ;;  %768 = vmatpush3.bf16.xpose.msra.mxu1 %v971_v2 }
 0x102   :  { %749 = vmatprep.subr.bf16.mxu0 %v900_v0  ;;  %769 = vmatprep.subr.bf16.mxu1 %v900_v0 }
 0x109   :  { %750 = vmatpush3.bf16.xpose.msra.mxu0 %v977_v3  ;;  %770 = vmatpush3.bf16.xpose.msra.mxu1 %v977_v3 }
 0x10a   :  { %751 = vmatprep.subr.bf16.mxu0 %v900_v0  ;;  %771 = vmatprep.subr.bf16.mxu1 %v900_v0 }
 0x111   :  { %752 = vmatpush3.bf16.xpose.msra.mxu0 %v983_v4  ;;  %772 = vmatpush3.bf16.xpose.msra.mxu1 %v983_v4 }
 0x112   :  { %753 = vmatprep.subr.bf16.mxu0 %v900_v0  ;;  %773 = vmatprep.subr.bf16.mxu1 %v900_v0 }
 0x119   :  { %754 = vmatpush3.bf16.xpose.msra.mxu0 %v989_v5  ;;  %774 = vmatpush3.bf16.xpose.msra.mxu1 %v989_v5 }
 0x11a   :  { %755 = vmatprep.subr.bf16.mxu0 %v900_v0  ;;  %775 = vmatprep.subr.bf16.mxu1 %v900_v0 }
 0x121   :  { %756 = vmatpush3.bf16.xpose.msra.mxu0 %v995_v6  ;;  %776 = vmatpush3.bf16.xpose.msra.mxu1 %v995_v6 }
 0x122   :  { %757 = vmatprep.subr.bf16.mxu0 %v900_v0  ;;  %777 = vmatprep.subr.bf16.mxu1 %v900_v0 }
 0x129   :  { %758 = vmatpush3.bf16.xpose.msra.mxu0 %v1001_v8  ;;  %778 = vmatpush3.bf16.xpose.msra.mxu1 %v1001_v8 }
 0x12a   :  { %759 = vmatprep.subr.bf16.mxu0 %v900_v0  ;;  %779 = vmatprep.subr.bf16.mxu1 %v900_v0 }
 0x131   :  { %760 = vmatpush3.bf16.xpose.msra.mxu0 %v1010_v15  ;;  %780 = vmatpush3.bf16.xpose.msra.mxu1 %v1010_v15 }
 0x138   :  { %762 = vmatmul.mubr.bf16.vlgmr.msra.gmra.mrb[12].mxu0 %v432_v46  ;;  %782 = vmatmul.mubr.bf16.vlgmr.msra.gmra.mrb[12].mxu1 %v483_v47 }
 0x14b   :  { %v161_v48 = vpop.f32.mrb[0].mxu0  ;;  %v209_v49 = vpop.f32.mrb[0].mxu1 }
 0x14c   :  { %vm215_vm1 = vcmp.gt.f32.partialorder %v209_v49, %v161_v48  ;;  %v643_v50 = vpop.f32.mrb[1].mxu0  ;;  %v663_v51 = vpop.f32.mrb[1].mxu1 }
 0x14d   :  { %v216_v52 = vsel %vm215_vm1, %v209_v49, %v161_v48  ;;  %v164_v53 = vpop.f32.mrb[2].mxu0  ;;  %v212_v54 = vpop.f32.mrb[2].mxu1  ;;  %v217_v59 = vsel %vm215_vm1, 1.0, %v900_v0 }
 0x14e   :  { %v644_v55 = vpop.f32.mrb[3].mxu0  ;;  %v664_v56 = vpop.f32.mrb[3].mxu1 }
 0x18b   :  { %v261_v57 = vpop.f32.mrb[4].mxu0  ;;  %v312_v58 = vpop.f32.mrb[4].mxu1 }
 0x18c   :  { %vm267_vm2 = vcmp.gt.f32.partialorder %v261_v57, %v216_v52  ;;  %v683_v60 = vpop.f32.mrb[5].mxu0  ;;  %v703_v61 = vpop.f32.mrb[5].mxu1 }
 0x18d   :  { %v268_v62 = vsel %vm267_vm2, %v261_v57, %v216_v52  ;;  %v269_v63 = vsel %vm267_vm2, 2.0, %v217_v59  ;;  %v264_v1 = vpop.f32.mrb[6].mxu0  ;;  %v315_v2 = vpop.f32.mrb[6].mxu1 }
 0x18e   :  { %vm318_vm3 = vcmp.gt.f32.partialorder %v312_v58, %v268_v62  ;;  %v684_v3 = vpop.f32.mrb[7].mxu0  ;;  %v704_v4 = vpop.f32.mrb[7].mxu1 }
 0x18f   :  { %v319_v5 = vsel %vm318_vm3, %v312_v58, %v268_v62  ;;  %v320_v6 = vsel %vm318_vm3, 3.0, %v269_v63 }
 0x1cb   :  { %v364_v7 = vpop.f32.mrb[8].mxu0  ;;  %v415_v8 = vpop.f32.mrb[8].mxu1 }
 0x1cc   :  { %vm370_vm4 = vcmp.gt.f32.partialorder %v364_v7, %v319_v5  ;;  %v723_v9 = vpop.f32.mrb[9].mxu0  ;;  %v743_v10 = vpop.f32.mrb[9].mxu1 }
 0x1cd   :  { %v371_v11 = vsel %vm370_vm4, %v364_v7, %v319_v5  ;;  %v372_v12 = vsel %vm370_vm4, 4.0, %v320_v6  ;;  %v367_v0 = vpop.f32.mrb[10].mxu0  ;;  %v418_v13 = vpop.f32.mrb[10].mxu1 }
 0x1ce   :  { %vm421_vm5 = vcmp.gt.f32.partialorder %v415_v8, %v371_v11  ;;  %v724_v14 = vpop.f32.mrb[11].mxu0  ;;  %v744_v15 = vpop.f32.mrb[11].mxu1 }
 0x1cf   :  { %v422_v16 = vsel %vm421_vm5, %v415_v8, %v371_v11  ;;  %v423_v17 = vsel %vm421_vm5, 5.0, %v372_v12 }
 0x20b   :  { %v467_v18 = vpop.f32.mrb[12].mxu0  ;;  %v518_v19 = vpop.f32.mrb[12].mxu1 }
 0x20c   :  { %vm473_vm6 = vcmp.gt.f32.partialorder %v467_v18, %v422_v16  ;;  %v763_v20 = vpop.f32.mrb[13].mxu0  ;;  %v783_v21 = vpop.f32.mrb[13].mxu1 }
 0x20d   :  { %v474_v22 = vsel %vm473_vm6, %v467_v18, %v422_v16  ;;  %v475_v23 = vsel %vm473_vm6, 6.0, %v423_v17  ;;  %v470_v24 = vpop.f32.mrb[14].mxu0  ;;  %v521_v25 = vpop.f32.mrb[14].mxu1 }
 0x20e   :  { %vm524_vm7 = vcmp.gt.f32.partialorder %v518_v19, %v474_v22  ;;  %v764_v26 = vpop.f32.mrb[15].mxu0  ;;  %v784_v27 = vpop.f32.mrb[15].mxu1 }
 0x20f   :  { %v525_v28 = vsel %vm524_vm7, 7.0, %v475_v23 }
 0x210   :  { %v526_v29 = vmul.f32 0.125, %v525_v28 }
 0x212   :  { %528 = vst [vmem:[#allocation8] sm:$0xff] %v526_v29 }
 0x213   :  { %878 = shalt.err (!%p875_p0)
}
 0x214   :  { %s879_s25 = scalar_lea.hbm %s1151_s3, 128 }
 0x215   :  { %p880_p1 = scmp.ne.s32.totalorder %s1151_s3, %s879_s25  ;;  %p883_p2 = scmp.lt.u32.totalorder %s879_s25, %s1151_s3 }
 0x217   :  { %p885_p3 = pnand %p883_p2, %p880_p1 }
 0x219   :  { %888 = shalt.err (!%p885_p3)
}
 0x21a   :  { %538 = dma.vmem_to_hbm [thread:$0]  %s536_s21, 128, %s1151_s3, [#allocation4]  }
 0x21b   :  { %893 = dma.done.wait [#allocation4], 128  }
 0x21c   :  { %894 = vsyncadd [#allocation4], 4294967168 }
 0x21d   :  { %542 = vsyncpa [#allocation3], 1 }
 0x21e   :  { %543 = vsyncpa [#allocation6], 1 }
 0x21f   :  { %544 = vsyncpa [#allocation4], 1 }

</bundles_post_ra>
